<compile_context>
chip_gen: v7x
topology: tpu7x:2x2x1
jax: 0.10.0
libtpu: 0.0.40
codegen_flags: <defaults>
</compile_context>

<pallas_src>
import functools

import jax
import jax.numpy as jnp
from jax.experimental import pallas as pl
from jax.experimental.pallas import tpu as pltpu

_VMEM_LIMIT = 32 * 1024 * 1024  # safe scoped-VMEM cap on v5e / v6e / v7x


def _pick_tile_m(M, max_tile=1024):
    """Largest row tile that divides M, is a multiple of 8, and <= max_tile,
    preferring >= 2 grid steps so both v7x TensorCores get work."""
    cap = min(max_tile, M // 2) if M >= 16 else M
    cap -= cap % 8
    for tm in range(cap, 7, -8):
        if M % tm == 0:
            return tm
    return M  # degenerate fallback: single block


# ----------------------------------------------------------------------------
# In-kernel helpers (all VMEM-side; matmuls in bf16, epilogues in f32)
# ----------------------------------------------------------------------------
def _pad_same_3x3(x):
    """Zero-pad (H, W, C) -> (H+2, W+2, C) inside the kernel (no HBM traffic)."""
    H, W, C = x.shape
    zr = jnp.zeros((1, W, C), x.dtype)
    x = jnp.concatenate([zr, x, zr], axis=0)
    zc = jnp.zeros((H + 2, 1, C), x.dtype)
    return jnp.concatenate([zc, x, zc], axis=1)


def _conv3x3_im2col(xpad, w_ref, s_ref, b_ref):
    """3x3 SAME conv + folded BN as ONE matmul: (H*W, 9*Cin) @ (9*Cin, Cout)."""
    Hp, Wp, Cin = xpad.shape
    H, W = Hp - 2, Wp - 2
    views = [xpad[dy:dy + H, dx:dx + W, :].reshape(H * W, Cin)
             for dy in range(3) for dx in range(3)]
    patch = jnp.concatenate(views, axis=-1)                      # (H*W, 9*Cin) bf16
    y = jnp.dot(patch, w_ref[...], preferred_element_type=jnp.float32)
    return y * s_ref[...] + b_ref[...]                           # (H*W, Cout) f32


# ----------------------------------------------------------------------------
# Kernel 1: fused conv1_a / conv1_b / conv1_c (1x1) + BN + ReLU, tiled over M
# ----------------------------------------------------------------------------
def _branch1x1_kernel(x_ref, w_ref, s_ref, b_ref, oa_ref, ob_ref, oc_ref):
    y = jnp.dot(x_ref[...], w_ref[...], preferred_element_type=jnp.float32)
    y = jnp.maximum(y * s_ref[...] + b_ref[...], 0.0)
    g = oa_ref.shape[-1]
    oa_ref[...] = y[:, :g].astype(oa_ref.dtype)
    ob_ref[...] = y[:, g:2 * g].astype(ob_ref.dtype)
    oc_ref[...] = y[:, 2 * g:].astype(oc_ref.dtype)


def branch_1x1(x_nhwc, w_cat, s_cat, b_cat, gw, tile_m):
    N, H, W, Cin = x_nhwc.shape
    M = N * H * W
    xf = x_nhwc.reshape(M, Cin).astype(jnp.bfloat16)
    outs = pl.pallas_call(
        _branch1x1_kernel,
        out_shape=tuple(jax.ShapeDtypeStruct((M, gw), jnp.bfloat16)
                        for _ in range(3)),
        grid=(M // tile_m,),
        in_specs=[
            pl.BlockSpec((tile_m, Cin), lambda i: (i, 0)),
            pl.BlockSpec((Cin, 3 * gw), lambda i: (0, 0)),
            pl.BlockSpec((1, 3 * gw), lambda i: (0, 0)),
            pl.BlockSpec((1, 3 * gw), lambda i: (0, 0)),
        ],
        out_specs=tuple(pl.BlockSpec((tile_m, gw), lambda i: (i, 0))
                        for _ in range(3)),
        compiler_params=pltpu.CompilerParams(
            dimension_semantics=("parallel",), vmem_limit_bytes=_VMEM_LIMIT),
    )(xf, w_cat.astype(jnp.bfloat16),
      s_cat.reshape(1, 3 * gw), b_cat.reshape(1, 3 * gw))
    return tuple(o.reshape(N, H, W, gw) for o in outs)


# ----------------------------------------------------------------------------
# Kernel 2: k1 = 3x3 SAME conv + BN + ReLU (one batch element per grid step)
# ----------------------------------------------------------------------------
def _conv3x3_relu_kernel(x_ref, w_ref, s_ref, b_ref, o_ref):
    H, W, C = o_ref.shape[1], o_ref.shape[2], o_ref.shape[3]
    y = _conv3x3_im2col(_pad_same_3x3(x_ref[0]), w_ref, s_ref, b_ref)
    o_ref[0] = jnp.maximum(y, 0.0).reshape(H, W, C).astype(o_ref.dtype)


def conv3x3_bn_relu(x_nhwc, w9, scale, bias):
    N, H, W, Cin = x_nhwc.shape
    Cout = w9.shape[-1]
    return pl.pallas_call(
        _conv3x3_relu_kernel,
        out_shape=jax.ShapeDtypeStruct((N, H, W, Cout), jnp.bfloat16),
        grid=(N,),
        in_specs=[
            pl.BlockSpec((1, H, W, Cin), lambda n: (n, 0, 0, 0)),
            pl.BlockSpec((9 * Cin, Cout), lambda n: (0, 0)),
            pl.BlockSpec((1, Cout), lambda n: (0, 0)),
            pl.BlockSpec((1, Cout), lambda n: (0, 0)),
        ],
        out_specs=pl.BlockSpec((1, H, W, Cout), lambda n: (n, 0, 0, 0)),
        compiler_params=pltpu.CompilerParams(
            dimension_semantics=("parallel",), vmem_limit_bytes=_VMEM_LIMIT),
    )(x_nhwc.astype(jnp.bfloat16),
      w9.reshape(9 * Cin, Cout).astype(jnp.bfloat16),
      scale.reshape(1, Cout), bias.reshape(1, Cout))


# ----------------------------------------------------------------------------
# Kernel 3: fused self-calibration chain (Conv3 / Conv3_e followed by ReLU):
#   out = relu(k4( k3(sigmoid(identity + k2(x_in))) * sigmoid(...) ))
# Intermediates stay in VMEM; no HBM round-trips between k2/k3/k4.
# ----------------------------------------------------------------------------
def _sc_chain_kernel(*refs, shared_input):
    if shared_input:
        (xin_ref, w2_ref, s2_ref, b2_ref, w3_ref, s3_ref, b3_ref,
         w4_ref, s4_ref, b4_ref, o_ref) = refs
        idn_ref = xin_ref
    else:
        (xin_ref, idn_ref, w2_ref, s2_ref, b2_ref, w3_ref, s3_ref, b3_ref,
         w4_ref, s4_ref, b4_ref, o_ref) = refs
    H, W, C = o_ref.shape[1], o_ref.shape[2], o_ref.shape[3]

    xin = xin_ref[0]                                              # (H, W, Cin) bf16
    y2 = _conv3x3_im2col(_pad_same_3x3(xin), w2_ref, s2_ref, b2_ref)
    idn = (xin if shared_input else idn_ref[0]).reshape(H * W, C)
    t1 = jax.nn.sigmoid(idn.astype(jnp.float32) + y2)             # f32

    y3 = _conv3x3_im2col(_pad_same_3x3(t1.reshape(H, W, C).astype(jnp.bfloat16)),
                         w3_ref, s3_ref, b3_ref)
    t2 = y3 * t1                                                  # f32

    y4 = _conv3x3_im2col(_pad_same_3x3(t2.reshape(H, W, C).astype(jnp.bfloat16)),
                         w4_ref, s4_ref, b4_ref)
    o_ref[0] = jnp.maximum(y4, 0.0).reshape(H, W, C).astype(o_ref.dtype)


def sc_chain(x_in, identity, w2, s2, b2, w3, s3, b3, w4, s4, b4):
    N, H, W, C = identity.shape
    assert x_in.shape == (N, H, W, C)
    shared = x_in is identity
    img_spec = pl.BlockSpec((1, H, W, C), lambda n: (n, 0, 0, 0))
    w_spec = pl.BlockSpec((9 * C, C), lambda n: (0, 0))
    v_spec = pl.BlockSpec((1, C), lambda n: (0, 0))

    in_specs = [img_spec] + ([] if shared else [img_spec]) \
        + [w_spec, v_spec, v_spec] * 3
    args = [x_in.astype(jnp.bfloat16)]
    if not shared:
        args.append(identity.astype(jnp.bfloat16))
    for w, s, b in ((w2, s2, b2), (w3, s3, b3), (w4, s4, b4)):
        args += [w.reshape(9 * C, C).astype(jnp.bfloat16),
                 s.reshape(1, C), b.reshape(1, C)]

    return pl.pallas_call(
        functools.partial(_sc_chain_kernel, shared_input=shared),
        out_shape=jax.ShapeDtypeStruct((N, H, W, C), jnp.bfloat16),
        grid=(N,),
        in_specs=in_specs,
        out_specs=pl.BlockSpec((1, H, W, C), lambda n: (n, 0, 0, 0)),
        compiler_params=pltpu.CompilerParams(
            dimension_semantics=("parallel",), vmem_limit_bytes=_VMEM_LIMIT),
    )(*args)


# ----------------------------------------------------------------------------
# Kernel 4: final 1x1 conv (w3 split per branch, no concat) + folded bn3
#           + downsample residual + ReLU, tiled over M
# ----------------------------------------------------------------------------
def _final_kernel(k1_ref, bb_ref, cc_ref, x_ref,
                  w3a_ref, w3b_ref, w3c_ref, wd_ref, s_ref, b_ref, o_ref):
    y = jnp.dot(k1_ref[...], w3a_ref[...], preferred_element_type=jnp.float32)
    y = y + jnp.dot(bb_ref[...], w3b_ref[...], preferred_element_type=jnp.float32)
    y = y + jnp.dot(cc_ref[...], w3c_ref[...], preferred_element_type=jnp.float32)
    y = y * s_ref[...] + b_ref[...]                                     # bn3
    y = y + jnp.dot(x_ref[...], wd_ref[...], preferred_element_type=jnp.float32)
    o_ref[...] = jnp.maximum(y, 0.0)


def final_1x1(out_k1, out_bb, out_cc, x, w3, wdown, s3, b3, tile_m):
    N, H, W, Cin = x.shape
    gw = out_k1.shape[-1]
    planes = w3.shape[-1]
    M = N * H * W
    w3 = w3.astype(jnp.bfloat16)
    out = pl.pallas_call(
        _final_kernel,
        out_shape=jax.ShapeDtypeStruct((M, planes), jnp.float32),
        grid=(M // tile_m,),
        in_specs=[
            pl.BlockSpec((tile_m, gw), lambda i: (i, 0)),
            pl.BlockSpec((tile_m, gw), lambda i: (i, 0)),
            pl.BlockSpec((tile_m, gw), lambda i: (i, 0)),
            pl.BlockSpec((tile_m, Cin), lambda i: (i, 0)),
            pl.BlockSpec((gw, planes), lambda i: (0, 0)),
            pl.BlockSpec((gw, planes), lambda i: (0, 0)),
            pl.BlockSpec((gw, planes), lambda i: (0, 0)),
            pl.BlockSpec((Cin, planes), lambda i: (0, 0)),
            pl.BlockSpec((1, planes), lambda i: (0, 0)),
            pl.BlockSpec((1, planes), lambda i: (0, 0)),
        ],
        out_specs=pl.BlockSpec((tile_m, planes), lambda i: (i, 0)),
        compiler_params=pltpu.CompilerParams(
            dimension_semantics=("parallel",), vmem_limit_bytes=_VMEM_LIMIT),
    )(out_k1.reshape(M, gw), out_bb.reshape(M, gw), out_cc.reshape(M, gw),
      x.reshape(M, Cin).astype(jnp.bfloat16),
      w3[:gw], w3[gw:2 * gw], w3[2 * gw:], wdown.astype(jnp.bfloat16),
      s3.reshape(1, planes), b3.reshape(1, planes))
    return out.reshape(N, H, W, planes)


# ----------------------------------------------------------------------------
# Parameter init (deterministic, synthetic, eval-mode BN folded)
# ----------------------------------------------------------------------------
def init_params(key, inplanes, planes, eps=1e-5, cardinality=1, bottleneck_width=32):
    gw = int(planes * (bottleneck_width / 64.0)) * cardinality
    keys = iter(jax.random.split(key, 64))

    def conv1x1(cin, cout):
        return 0.1 * jax.random.normal(next(keys), (cin, cout), jnp.float32)

    def conv3x3(cin, cout):
        return 0.1 * jax.random.normal(next(keys), (9, cin, cout), jnp.float32)

    def bn(c):
        g = 1.0 + 0.1 * jax.random.normal(next(keys), (c,), jnp.float32)
        b = 0.1 * jax.random.normal(next(keys), (c,), jnp.float32)
        m = 0.1 * jax.random.normal(next(keys), (c,), jnp.float32)
        v = 1.0 + jax.random.uniform(next(keys), (c,), jnp.float32)
        scale = g / jnp.sqrt(v + eps)
        bias = b - m * scale
        return scale, bias

    P = {"gw": gw}
    for tag in ("1a", "1b", "1c"):
        P["w" + tag] = conv1x1(inplanes, gw)
        P["s" + tag], P["b" + tag] = bn(gw)
    # fused copies for the single branch-1x1 kernel
    P["w1abc"] = jnp.concatenate([P["w1a"], P["w1b"], P["w1c"]], axis=1)
    P["s1abc"] = jnp.concatenate([P["s1a"], P["s1b"], P["s1c"]])
    P["b1abc"] = jnp.concatenate([P["b1a"], P["b1b"], P["b1c"]])
    P["wk1"] = conv3x3(gw, gw); P["sk1"], P["bk1"] = bn(gw)
    for br in ("b", "c"):                   # scconv3_b (Conv3) / scconv3_c (Conv3_e)
        for k in ("k2", "k3", "k4"):
            P["w" + k + br] = conv3x3(gw, gw)
            P["s" + k + br], P["b" + k + br] = bn(gw)
    P["w3"] = conv1x1(3 * gw, planes); P["s3"], P["b3"] = bn(planes)
    P["wdown"] = conv1x1(inplanes, planes)
    return P


# ----------------------------------------------------------------------------
# Bottleneck_e forward (Pallas)
# ----------------------------------------------------------------------------
def bottleneck_e_forward(x, x_e, P):
    gw = P["gw"]
    N, H, W, _ = x.shape
    tile_m = _pick_tile_m(N * H * W)

    out_a, out_b, out_c = branch_1x1(x, P["w1abc"], P["s1abc"], P["b1abc"], gw, tile_m)

    out_k1 = conv3x3_bn_relu(out_a, P["wk1"], P["sk1"], P["bk1"])

    # scconv3_b = Conv3(out_b) ; relu   (k2 input == identity -> single DMA)
    out_bb = sc_chain(out_b, out_b,
                      P["wk2b"], P["sk2b"], P["bk2b"],
                      P["wk3b"], P["sk3b"], P["bk3b"],
                      P["wk4b"], P["sk4b"], P["bk4b"])

    # scconv3_c = Conv3_e(out_c, x_e) ; relu   (k2 acts on x_e, identity is out_c)
    out_cc = sc_chain(x_e, out_c,
                      P["wk2c"], P["sk2c"], P["bk2c"],
                      P["wk3c"], P["sk3c"], P["bk3c"],
                      P["wk4c"], P["sk4c"], P["bk4c"])

    return final_1x1(out_k1, out_bb, out_cc, x,
                     P["w3"], P["wdown"], P["s3"], P["b3"], tile_m)


# ----------------------------------------------------------------------------
# Pure-JAX f32 reference (for correctness check)
# ----------------------------------------------------------------------------
def _ref_c1(x, w, s, b, relu):
    y = jnp.einsum("nhwc,co->nhwo", x, w) * s + b
    return jnp.maximum(y, 0.0) if relu else y


def _ref_c3(x, w9, s, b):
    cin, cout = w9.shape[1], w9.shape[2]
    w = w9.reshape(3, 3, cin, cout)
    y = jax.lax.conv_general_dilated(
        x, w, (1, 1), "SAME", dimension_numbers=("NHWC", "HWIO", "NHWC"))
    return y * s + b


def ref_forward(x, x_e, P):
    out_a = _ref_c1(x, P["w1a"], P["s1a"], P["b1a"], True)
    out_b = _ref_c1(x, P["w1b"], P["s1b"], P["b1b"], True)
    out_c = _ref_c1(x, P["w1c"], P["s1c"], P["b1c"], True)
    out_k1 = jnp.maximum(_ref_c3(out_a, P["wk1"], P["sk1"], P["bk1"]), 0.0)
    b1 = jax.nn.sigmoid(out_b + _ref_c3(out_b, P["wk2b"], P["sk2b"], P["bk2b"]))
    b2 = _ref_c3(b1, P["wk3b"], P["sk3b"], P["bk3b"]) * b1
    out_bb = jnp.maximum(_ref_c3(b2, P["wk4b"], P["sk4b"], P["bk4b"]), 0.0)
    c1 = jax.nn.sigmoid(out_c + _ref_c3(x_e, P["wk2c"], P["sk2c"], P["bk2c"]))
    c2 = _ref_c3(c1, P["wk3c"], P["sk3c"], P["bk3c"]) * c1
    out_cc = jnp.maximum(_ref_c3(c2, P["wk4c"], P["sk4c"], P["bk4c"]), 0.0)
    cat = jnp.concatenate([out_k1, out_bb, out_cc], axis=-1)
    residual = jnp.einsum("nhwc,co->nhwo", x, P["wdown"])
    out = _ref_c1(cat, P["w3"], P["s3"], P["b3"], False) + residual
    return jnp.maximum(out, 0.0)


# ----------------------------------------------------------------------------
if __name__ == "__main__":
    N, H, W = 2, 16, 16
    inplanes, planes = 64, 64        # group_width = 32 -> lane-friendlier channels

    key = jax.random.PRNGKey(0)
    kx, ke, kp = jax.random.split(key, 3)
    P = init_params(kp, inplanes, planes)
    gw = P["gw"]

    x = jax.random.normal(kx, (N, H, W, inplanes), jnp.float32)   # layout: NHWC
    x_e = jax.random.normal(ke, (N, H, W, gw), jnp.float32)       # layout: NHWC

    out = jax.block_until_ready(bottleneck_e_forward(x, x_e, P))
    ref = jax.block_until_ready(ref_forward(x, x_e, P))

    assert out.shape == (N, H, W, planes)
    err = jnp.max(jnp.abs(out - ref))
    # bf16 MXU operands vs. pure-f32 reference -> bf16-level tolerance
    assert jnp.allclose(out, ref, atol=5e-2, rtol=5e-2), f"max abs err {err}"
    print("KERNEL_OK")
</pallas_src>

<mosaic_0001>
module attributes {stable_mosaic.version = 11 : i64} {
  func.func @_branch1x1_kernel(%arg0: i32, %arg1: memref<256x64xbf16, #tpu.memory_space<vmem>>, %arg2: memref<64x96xbf16, #tpu.memory_space<vmem>>, %arg3: memref<1x96xf32, #tpu.memory_space<vmem>>, %arg4: memref<1x96xf32, #tpu.memory_space<vmem>>, %arg5: memref<256x32xbf16, #tpu.memory_space<vmem>>, %arg6: memref<256x32xbf16, #tpu.memory_space<vmem>>, %arg7: memref<256x32xbf16, #tpu.memory_space<vmem>>) attributes {dimension_semantics = [#tpu.dimension_semantics<parallel>], iteration_bounds = array<i64: 2>, scalar_prefetch = 0 : i64, scratch_operands = 0 : i64, tpu.core_type = #tpu.core_type<tc>, window_params = [{transform_indices = @transform_0, window_bounds = array<i64: 256, 64>}, {pipeline_mode = #tpu.pipeline_mode<synchronous>, transform_indices = @transform_1, window_bounds = array<i64: 64, 96>}, {pipeline_mode = #tpu.pipeline_mode<synchronous>, transform_indices = @transform_2, window_bounds = array<i64: 1, 96>}, {pipeline_mode = #tpu.pipeline_mode<synchronous>, transform_indices = @transform_3, window_bounds = array<i64: 1, 96>}, {transform_indices = @transform_4, window_bounds = array<i64: 256, 32>}, {transform_indices = @transform_5, window_bounds = array<i64: 256, 32>}, {transform_indices = @transform_6, window_bounds = array<i64: 256, 32>}]} {
    %c0 = arith.constant 0 : index
    %c0_0 = arith.constant 0 : index
    %0 = vector.load %arg1[%c0, %c0_0] : memref<256x64xbf16, #tpu.memory_space<vmem>>, vector<256x64xbf16>
    %c0_1 = arith.constant 0 : index
    %c0_2 = arith.constant 0 : index
    %1 = vector.load %arg2[%c0_1, %c0_2] : memref<64x96xbf16, #tpu.memory_space<vmem>>, vector<64x96xbf16>
    %cst = arith.constant dense<0.000000e+00> : vector<256x96xf32>
    %2 = tpu.matmul %0, %1, %cst {dimension_numbers = #tpu.dot_dimension_numbers<[1], [0], [0], [1], [0, 0, 1, 1], [], []>} : vector<256x64xbf16>, vector<64x96xbf16>, vector<256x96xf32> -> vector<256x96xf32>
    %c0_3 = arith.constant 0 : index
    %c0_4 = arith.constant 0 : index
    %3 = vector.load %arg3[%c0_3, %c0_4] : memref<1x96xf32, #tpu.memory_space<vmem>>, vector<1x96xf32>
    %4 = vector.broadcast %3 : vector<1x96xf32> to vector<256x96xf32>
    %5 = arith.mulf %2, %4 : vector<256x96xf32>
    %c0_5 = arith.constant 0 : index
    %c0_6 = arith.constant 0 : index
    %6 = vector.load %arg4[%c0_5, %c0_6] : memref<1x96xf32, #tpu.memory_space<vmem>>, vector<1x96xf32>
    %7 = vector.broadcast %6 : vector<1x96xf32> to vector<256x96xf32>
    %8 = arith.addf %5, %7 : vector<256x96xf32>
    %cst_7 = arith.constant 0.000000e+00 : f32
    %9 = vector.broadcast %cst_7 : f32 to vector<256x96xf32>
    %10 = arith.maximumf %8, %9 : vector<256x96xf32>
    %11 = vector.extract_strided_slice %10 {offsets = [0, 0], sizes = [256, 32], strides = [1, 1]} : vector<256x96xf32> to vector<256x32xf32>
    %12 = arith.truncf %11 : vector<256x32xf32> to vector<256x32xbf16>
    %c0_8 = arith.constant 0 : index
    %c0_9 = arith.constant 0 : index
    %13 = vector.load %arg5[%c0_8, %c0_9] : memref<256x32xbf16, #tpu.memory_space<vmem>>, vector<256x32xbf16>
    tpu.vector_store %arg5[%c0_8, %c0_9], %12 {strides = array<i32>} : memref<256x32xbf16, #tpu.memory_space<vmem>>, vector<256x32xbf16>,
    %14 = vector.extract_strided_slice %10 {offsets = [0, 32], sizes = [256, 32], strides = [1, 1]} : vector<256x96xf32> to vector<256x32xf32>
    %15 = arith.truncf %14 : vector<256x32xf32> to vector<256x32xbf16>
    %c0_10 = arith.constant 0 : index
    %c0_11 = arith.constant 0 : index
    %16 = vector.load %arg6[%c0_10, %c0_11] : memref<256x32xbf16, #tpu.memory_space<vmem>>, vector<256x32xbf16>
    tpu.vector_store %arg6[%c0_10, %c0_11], %15 {strides = array<i32>} : memref<256x32xbf16, #tpu.memory_space<vmem>>, vector<256x32xbf16>,
    %17 = vector.extract_strided_slice %10 {offsets = [0, 64], sizes = [256, 32], strides = [1, 1]} : vector<256x96xf32> to vector<256x32xf32>
    %18 = arith.truncf %17 : vector<256x32xf32> to vector<256x32xbf16>
    %c0_12 = arith.constant 0 : index
    %c0_13 = arith.constant 0 : index
    %19 = vector.load %arg7[%c0_12, %c0_13] : memref<256x32xbf16, #tpu.memory_space<vmem>>, vector<256x32xbf16>
    tpu.vector_store %arg7[%c0_12, %c0_13], %18 {strides = array<i32>} : memref<256x32xbf16, #tpu.memory_space<vmem>>, vector<256x32xbf16>,
    return
  }
  func.func @transform_0(%arg0: i32) -> (i32, i32) {
    %c0_i32 = arith.constant 0 : i32
    %c0_i32_0 = arith.constant 0 : i32
    return %arg0, %c0_i32 : i32, i32
  }
  func.func @transform_1(%arg0: i32) -> (i32, i32) {
    %c0_i32 = arith.constant 0 : i32
    %c0_i32_0 = arith.constant 0 : i32
    %c0_i32_1 = arith.constant 0 : i32
    return %c0_i32, %c0_i32_0 : i32, i32
  }
  func.func @transform_2(%arg0: i32) -> (i32, i32) {
    %c0_i32 = arith.constant 0 : i32
    %c0_i32_0 = arith.constant 0 : i32
    %c0_i32_1 = arith.constant 0 : i32
    return %c0_i32, %c0_i32_0 : i32, i32
  }
  func.func @transform_3(%arg0: i32) -> (i32, i32) {
    %c0_i32 = arith.constant 0 : i32
    %c0_i32_0 = arith.constant 0 : i32
    %c0_i32_1 = arith.constant 0 : i32
    return %c0_i32, %c0_i32_0 : i32, i32
  }
  func.func @transform_4(%arg0: i32) -> (i32, i32) {
    %c0_i32 = arith.constant 0 : i32
    %c0_i32_0 = arith.constant 0 : i32
    return %arg0, %c0_i32 : i32, i32
  }
  func.func @transform_5(%arg0: i32) -> (i32, i32) {
    %c0_i32 = arith.constant 0 : i32
    %c0_i32_0 = arith.constant 0 : i32
    return %arg0, %c0_i32 : i32, i32
  }
  func.func @transform_6(%arg0: i32) -> (i32, i32) {
    %c0_i32 = arith.constant 0 : i32
    %c0_i32_0 = arith.constant 0 : i32
    return %arg0, %c0_i32 : i32, i32
  }
}

</mosaic_0001>

<bundles_post_ra>
// kernel: tpu_custom_call.1
= control target key start
LH: loop header
LB: loop body
LE: loop exit
PB: predicated region body
PF: predicated region fallthrough
CT: control target
= control target key end

     0   :  { %s1548_s21 = smov 0   ;;  %s2089_s0 = inlined_call_operand.vmem [shape: bf16[512,64], index: 0, kind: input, shape index: {}]   ;;  %s2090_s1 = inlined_call_operand.vmem [shape: bf16[64,96], index: 1, kind: input, shape index: {}]   ;;  %s2091_s2 = inlined_call_operand.vmem [shape: f32[1,96], index: 2, kind: input, shape index: {}]   ;;  %s2092_s3 = inlined_call_operand.vmem [shape: f32[1,96], index: 3, kind: input, shape index: {}]   ;;  %s2093_s4 = inlined_call_operand.vmem [shape: bf16[512,32], index: 4, kind: output, shape index: {0}]   ;;  %s2094_s5 = inlined_call_operand.vmem [shape: bf16[512,32], index: 5, kind: output, shape index: {1}]   ;;  %s2095_s6 = inlined_call_operand.vmem [shape: bf16[512,32], index: 6, kind: output, shape index: {2}]  }
   0x1 LB: > { %s1288_s22 = sadd.s32 4294967295, %s1509_s21   ;;  %p1292_p0 = scmp.ge.s32.totalorder %s1509_s21, 1  ;;  %s1509_s21 = sphi %s1548_s21, %s17_s21  }
   0x2   : > { %p218_p1 = scmp.lt.s32.totalorder %s1509_s21, 3 }
   0x4   : > { %p219_p2 = pnand %p1292_p0, %p218_p1 }
   0x5   : > { %v1483_v0 = vld [vmem:[%s2090_s1] sm:$0xff] (!%p219_p2)   ;;  %s1293_s25 = sshll.u32 (!%p219_p2), %s1288_s22, 5  ;;  %v1484_v1 = vld [vmem:[%s2090_s1 + $0x8] sm:$0xff] (!%p219_p2)   ;;  %v1485_v2 = vld [vmem:[%s2090_s1 + $0x10] sm:$0xff] (!%p219_p2)   ;;  %vm427_vm0 = vcmask (!%p219_p2), 523264   ;;  %vm875_vm1 = vcmask (!%p219_p2), 257024  }
   0x6   : > { %222 = sbr.rel (%p219_p2) target bundleno = 483 (0x1e3), region = 36  ;;  %p259_p3 = scmp.lt.s32.totalorder (!%p219_p2), %s1293_s25, 63  ;;  %1425 = vmatprep.subr.bf16.mxu0 (!%p219_p2), %v1483_v0  ;;  %1465 = vmatprep.subr.bf16.mxu1 (!%p219_p2), %v1483_v0  ;;  %v1486_v3 = vld [vmem:[%s2090_s1 + $0x18] sm:$0xff] (!%p219_p2)   ;;  %v1611_v20 = vld [vmem:[%s2091_s2] ss:$0 sm:$0xff] (!%p219_p2) }
   0x7   : > { %1426 = vmatpush3.bf16.msra.mxu0 (!%p219_p2), %v1483_v0  ;;  %1469 = vmatpush3.bf16.msra.mxu1 (!%p219_p2), %v1483_v0  ;;  %v1616_v22 = vld [vmem:[%s2092_s3] ss:$0 sm:$0xff] (!%p219_p2)  ;;  %s1511_s19 = smov (!%p219_p2), 96   ;;  %s1512_s20 = smov (!%p219_p2), 64  }
   0x8   : > { %1427 = vmatprep.subr.bf16.mxu0 (!%p219_p2), %v1484_v1  ;;  %1466 = vmatprep.subr.bf16.mxu1 (!%p219_p2), %v1484_v1 }
   0xb   : > { %1428 = vmatpush3.bf16.msra.mxu0 (!%p219_p2), %v1484_v1  ;;  %1470 = vmatpush3.bf16.msra.mxu1 (!%p219_p2), %v1484_v1 }
   0xc   : > { %1429 = vmatprep.subr.bf16.mxu0 (!%p219_p2), %v1485_v2  ;;  %1467 = vmatprep.subr.bf16.mxu1 (!%p219_p2), %v1485_v2 }
   0xd   : > { %s2097_s25 = smov (!%p259_p3, %s1293_s25), 63 }
   0xe   : > { %s1565_s30 = sshll.u32 %s2097_s25, 2 }
   0xf   : > { %s1574_s11 = scalar_lea.vmem %s2089_s0, %s1565_s30  ;;  %1430 = vmatpush3.bf16.msra.mxu0 %v1485_v2  ;;  %1471 = vmatpush3.bf16.msra.mxu1 %v1485_v2  ;;  %s1636_s18 = scalar_lea.vmem %s2093_s4, %s1565_s30 }
  0x10   : > { %v1487_v4 = vld [vmem:[%s1574_s11] sm:$0xff]   ;;  %1431 = vmatprep.subr.bf16.mxu0 %v1486_v3  ;;  %1468 = vmatprep.subr.bf16.mxu1 %v1486_v3  ;;  %v1489_v6 = vld [vmem:[%s1574_s11 + $0x8] sm:$0xff]   ;;  %v1491_v8 = vld [vmem:[%s1574_s11 + $0x10] sm:$0xff]   ;;  %s1940_s24 = scalar_lea.vmem %s2094_s5, %s1565_s30  ;;  %s1953_s27 = scalar_lea.vmem %s2095_s6, %s1565_s30 }
  0x11   : > { %v1488_v5 = vld [vmem:[%s1574_s11 + $0x40] sm:$0xff]   ;;  %1433 = vmatprep.mubr.msk.bf16.mxu0 %vm427_vm0, %v1487_v4  ;;  %v1490_v7 = vld [vmem:[%s1574_s11 + $0x48] sm:$0xff]   ;;  %v1493_v9 = vld [vmem:[%s1574_s11 + $0x50] sm:$0xff]  }
  0x12   : > { %1449 = vmatprep.mubr.msk.bf16.mxu1 %vm427_vm0, %v1488_v5  ;;  %v1492_v10 = vld [vmem:[%s1574_s11 + $0x18] sm:$0xff]   ;;  %v1495_v12 = vld [vmem:[%s1574_s11 + $0x20] sm:$0xff]   ;;  %v1496_v14 = vld [vmem:[%s1574_s11 + $0x28] sm:$0xff]  }
  0x13   : > { %1432 = vmatpush3.bf16.msra.mxu0 %v1486_v3  ;;  %1472 = vmatpush3.bf16.msra.mxu1 %v1486_v3  ;;  %v1494_v11 = vld [vmem:[%s1574_s11 + $0x58] sm:$0xff]   ;;  %v1497_v13 = vld [vmem:[%s1574_s11 + $0x60] sm:$0xff]   ;;  %v1498_v15 = vld [vmem:[%s1574_s11 + $0x68] sm:$0xff]  }
  0x14   : > { %v1499_v16 = vld [vmem:[%s1574_s11 + $0x30] sm:$0xff]   ;;  %v1500_v18 = vld [vmem:[%s1574_s11 + $0x38] sm:$0xff]  }
  0x15   : > { %v1501_v17 = vld [vmem:[%s1574_s11 + $0x70] sm:$0xff]   ;;  %v1502_v19 = vld [vmem:[%s1574_s11 + $0x78] sm:$0xff]  }
  0x16   : > { %1434 = vmatmul.mubr.msk.bf16.vlgmr.msra.gmra.mrb[0].mxu0 %vm427_vm0, %v1489_v6  ;;  %1450 = vmatmul.mubr.msk.bf16.vlgmr.msra.gmra.mrb[0].mxu1 %vm427_vm0, %v1490_v7 }
  0x17   : > { %1437 = vmatprep.mubr.msk.bf16.mxu0 %vm427_vm0, %v1491_v8  ;;  %1453 = vmatprep.mubr.msk.bf16.mxu1 %vm427_vm0, %v1493_v9 }
  0x1e   : > { %1438 = vmatmul.mubr.msk.bf16.gmra.mrb[4].mxu0 %vm427_vm0, %v1492_v10  ;;  %1454 = vmatmul.mubr.msk.bf16.gmra.mrb[4].mxu1 %vm427_vm0, %v1494_v11 }
  0x1f   : > { %1441 = vmatprep.mubr.msk.bf16.mxu0 %vm427_vm0, %v1495_v12  ;;  %1457 = vmatprep.mubr.msk.bf16.mxu1 %vm427_vm0, %v1497_v13 }
  0x26   : > { %1442 = vmatmul.mubr.msk.bf16.gmra.mrb[8].mxu0 %vm427_vm0, %v1496_v14  ;;  %1458 = vmatmul.mubr.msk.bf16.gmra.mrb[8].mxu1 %vm427_vm0, %v1498_v15 }
  0x27   : > { %1445 = vmatprep.mubr.msk.bf16.mxu0 %vm427_vm0, %v1499_v16  ;;  %1461 = vmatprep.mubr.msk.bf16.mxu1 %vm427_vm0, %v1501_v17 }
  0x2e   : > { %1446 = vmatmul.mubr.msk.bf16.gmra.mrb[12].mxu0 %vm427_vm0, %v1500_v18  ;;  %1462 = vmatmul.mubr.msk.bf16.gmra.mrb[12].mxu1 %vm427_vm0, %v1502_v19 }
  0xe9   : > { %v1435_v21 = vpop.f32.mrb[0].mxu0  ;;  %v1451_v23 = vpop.f32.mrb[0].mxu1 }
  0xea   : > { %v646_v24 = vmul.f32 %v1435_v21, %v1611_v20  ;;  %v662_v25 = vmul.f32 %v1451_v23, %v1611_v20  ;;  %v510_v26 = vpop.f32.mrb[1].mxu0  ;;  %v574_v27 = vpop.f32.mrb[1].mxu1 }
  0xeb   : > { %v644_v28 = vmul.f32 %v1611_v20, %v510_v26  ;;  %v660_v29 = vmul.f32 %v1611_v20, %v574_v27  ;;  %v1436_v30 = vpop.f32.mrb[2].mxu0  ;;  %v1452_v31 = vpop.f32.mrb[2].mxu1 }
  0xec   : > { %v685_v32 = vadd.f32 %v1616_v22, %v646_v24  ;;  %v701_v33 = vadd.f32 %v1616_v22, %v662_v25  ;;  %v647_v34 = vmul.f32 %v1436_v30, %v1611_v20  ;;  %v663_v35 = vmul.f32 %v1452_v31, %v1611_v20  ;;  %v513_v36 = vpop.f32.mrb[3].mxu0  ;;  %v577_v37 = vpop.f32.mrb[3].mxu1 }
  0xed   : > { %v683_v38 = vadd.f32 %v1616_v22, %v644_v28  ;;  %v699_v39 = vadd.f32 %v1616_v22, %v660_v29  ;;  %v645_v40 = vmul.f32 %v1611_v20, %v513_v36  ;;  %v661_v41 = vmul.f32 %v1611_v20, %v577_v37 }
  0xee   : > { %v717_v42 = vmax.f32 %v685_v32, 0.0  ;;  %v733_v43 = vmax.f32 %v701_v33, 0.0  ;;  %v686_v44 = vadd.f32 %v1616_v22, %v647_v34  ;;  %v702_v45 = vadd.f32 %v1616_v22, %v663_v35 }
  0xef   : > { %v715_v46 = vmax.f32 %v683_v38, 0.0  ;;  %v731_v47 = vmax.f32 %v699_v39, 0.0  ;;  %v684_v48 = vadd.f32 %v1616_v22, %v645_v40  ;;  %v700_v49 = vadd.f32 %v1616_v22, %v661_v41 }
  0xf0   : > { %v1375_v50 = vpack.c.bf16 %v717_v42, %v717_v42  ;;  %v1391_v51 = vpack.c.bf16 %v733_v43, %v733_v43  ;;  %v718_v52 = vmax.f32 %v686_v44, 0.0  ;;  %v734_v53 = vmax.f32 %v702_v45, 0.0 }
  0xf1   : > { %v1640_v54 = vpack.c.bf16 %v715_v46, %v715_v46  ;;  %v1642_v55 = vpack.c.bf16 %v731_v47, %v731_v47  ;;  %v716_v56 = vmax.f32 %v684_v48, 0.0  ;;  %v732_v57 = vmax.f32 %v700_v49, 0.0  ;;  %v1439_v58 = vpop.f32.mrb[4].mxu0  ;;  %v1455_v59 = vpop.f32.mrb[4].mxu1 }
  0xf2   : > { %878 = vst.msk [vmem:[%s1636_s18 + $0x8] sm:$0xf] %vm875_vm1, %v1375_v50  ;;  %894 = vst.msk [vmem:[%s1636_s18 + $0x48] sm:$0xf] %vm875_vm1, %v1391_v51  ;;  %v1648_v60 = vpack.c.bf16 %v718_v52, %v718_v52  ;;  %v1650_v61 = vpack.c.bf16 %v734_v53, %v734_v53  ;;  %944 = vrot.lane.b32.xlu0 %v1391_v51, %s1511_s19  ;;  %912 = vrot.lane.b32.xlu1 %v1375_v50, %s1511_s19  ;;  %v526_v63 = vpop.f32.mrb[5].mxu0  ;;  %v590_v0 = vpop.f32.mrb[5].mxu1 }
  0xf3   : > { %v650_v62 = vmul.f32 %v1439_v58, %v1611_v20  ;;  %876 = vst.msk [vmem:[%s1636_s18] sm:$0xf] %vm875_vm1, %v1640_v54  ;;  %892 = vst.msk [vmem:[%s1636_s18 + $0x40] sm:$0xf] %vm875_vm1, %v1642_v55  ;;  %v1661_v1 = vpack.c.bf16 %v716_v56, %v716_v56  ;;  %v1663_v2 = vpack.c.bf16 %v732_v57, %v732_v57  ;;  %v1440_v4 = vpop.f32.mrb[6].mxu0  ;;  %v1456_v6 = vpop.f32.mrb[6].mxu1 }
  0xf4   : > { %v648_v3 = vmul.f32 %v1611_v20, %v526_v63  ;;  %v666_v5 = vmul.f32 %v1455_v59, %v1611_v20  ;;  %879 = vst.msk [vmem:[%s1636_s18 + $0xc] sm:$0xf] %vm875_vm1, %v1648_v60  ;;  %895 = vst.msk [vmem:[%s1636_s18 + $0x4c] sm:$0xf] %vm875_vm1, %v1650_v61  ;;  %v651_v8 = vmul.f32 %v1440_v4, %v1611_v20  ;;  %v529_v9 = vpop.f32.mrb[7].mxu0  ;;  %v593_v12 = vpop.f32.mrb[7].mxu1 }
  0xf5   : > { %v689_v7 = vadd.f32 %v1616_v22, %v650_v62  ;;  %v664_v10 = vmul.f32 %v1611_v20, %v590_v0  ;;  %v667_v11 = vmul.f32 %v1456_v6, %v1611_v20  ;;  %877 = vst.msk [vmem:[%s1636_s18 + $0x4] sm:$0xf] %vm875_vm1, %v1661_v1  ;;  %893 = vst.msk [vmem:[%s1636_s18 + $0x44] sm:$0xf] %vm875_vm1, %v1663_v2 }
  0xf6   : > { %v687_v13 = vadd.f32 %v1616_v22, %v648_v3  ;;  %v649_v14 = vmul.f32 %v1611_v20, %v529_v9  ;;  %v705_v15 = vadd.f32 %v1616_v22, %v666_v5  ;;  %v665_v16 = vmul.f32 %v1611_v20, %v593_v12  ;;  %1040 = vrot.lane.b32.xlu0 %v1375_v50, %s1512_s20 }
  0xf7   : > { %914 = vrot.lane.b32.xlu1 %v1648_v60, %s1511_s19  ;;  %v721_v17 = vmax.f32 %v689_v7, 0.0  ;;  %v690_v18 = vadd.f32 %v1616_v22, %v651_v8  ;;  %v703_v19 = vadd.f32 %v1616_v22, %v664_v10  ;;  %v706_v21 = vadd.f32 %v1616_v22, %v667_v11 }
  0xf8   : > { %v719_v23 = vmax.f32 %v687_v13, 0.0  ;;  %v688_v24 = vadd.f32 %v1616_v22, %v649_v14  ;;  %v737_v25 = vmax.f32 %v705_v15, 0.0  ;;  %v704_v26 = vadd.f32 %v1616_v22, %v665_v16 }
  0xf9   : > { %v1695_v27 = vpack.c.bf16 %v721_v17, %v721_v17  ;;  %v722_v28 = vmax.f32 %v690_v18, 0.0  ;;  %v735_v29 = vmax.f32 %v703_v19, 0.0  ;;  %v738_v30 = vmax.f32 %v706_v21, 0.0  ;;  %v1443_v35 = vpop.f32.mrb[8].mxu0  ;;  %v1459_v36 = vpop.f32.mrb[8].mxu1 }
  0xfa   : > { %v1697_v31 = vpack.c.bf16 %v719_v23, %v719_v23  ;;  %v720_v32 = vmax.f32 %v688_v24, 0.0  ;;  %v1699_v33 = vpack.c.bf16 %v737_v25, %v737_v25  ;;  %v736_v34 = vmax.f32 %v704_v26, 0.0  ;;  %1072 = vrot.lane.b32.xlu0 %v1391_v51, %s1512_s20  ;;  %v542_v40 = vpop.f32.mrb[9].mxu0  ;;  %v606_v41 = vpop.f32.mrb[9].mxu1 }
  0xfb   : > { %946 = vrot.lane.b32.xlu1 %v1650_v61, %s1511_s19  ;;  %882 = vst.msk [vmem:[%s1636_s18 + $0x18] sm:$0xf] %vm875_vm1, %v1695_v27  ;;  %v1707_v37 = vpack.c.bf16 %v722_v28, %v722_v28  ;;  %v1709_v38 = vpack.c.bf16 %v735_v29, %v735_v29  ;;  %v1711_v39 = vpack.c.bf16 %v738_v30, %v738_v30  ;;  %v1444_v46 = vpop.f32.mrb[10].mxu0  ;;  %v1460_v47 = vpop.f32.mrb[10].mxu1 }
  0xfc   : > { %880 = vst.msk [vmem:[%s1636_s18 + $0x10] sm:$0xf] %vm875_vm1, %v1697_v31  ;;  %v1716_v42 = vpack.c.bf16 %v720_v32, %v720_v32  ;;  %898 = vst.msk [vmem:[%s1636_s18 + $0x58] sm:$0xf] %vm875_vm1, %v1699_v33  ;;  %v1721_v43 = vpack.c.bf16 %v736_v34, %v736_v34  ;;  %v654_v44 = vmul.f32 %v1443_v35, %v1611_v20  ;;  %v545_v49 = vpop.f32.mrb[11].mxu0  ;;  %v609_v53 = vpop.f32.mrb[11].mxu1 }
  0xfd   : > { %v652_v45 = vmul.f32 %v1611_v20, %v542_v40  ;;  %883 = vst.msk [vmem:[%s1636_s18 + $0x1c] sm:$0xf] %vm875_vm1, %v1707_v37  ;;  %896 = vst.msk [vmem:[%s1636_s18 + $0x50] sm:$0xf] %vm875_vm1, %v1709_v38  ;;  %v655_v48 = vmul.f32 %v1444_v46, %v1611_v20  ;;  %v670_v50 = vmul.f32 %v1459_v36, %v1611_v20 }
  0xfe   : > { %899 = vst.msk [vmem:[%s1636_s18 + $0x5c] sm:$0xf] %vm875_vm1, %v1711_v39  ;;  %v668_v51 = vmul.f32 %v1611_v20, %v606_v41  ;;  %v671_v52 = vmul.f32 %v1460_v47, %v1611_v20  ;;  %881 = vst.msk [vmem:[%s1636_s18 + $0x14] sm:$0xf] %vm875_vm1, %v1716_v42  ;;  %v693_v56 = vadd.f32 %v1616_v22, %v654_v44  ;;  %908 = vrot.lane.b32.xlu0 %v1640_v54, %s1511_s19 }
  0xff   : > { %897 = vst.msk [vmem:[%s1636_s18 + $0x54] sm:$0xf] %vm875_vm1, %v1721_v43  ;;  %v691_v57 = vadd.f32 %v1616_v22, %v652_v45  ;;  %v653_v58 = vmul.f32 %v1611_v20, %v545_v49  ;;  %v669_v59 = vmul.f32 %v1611_v20, %v609_v53  ;;  %1042 = vrot.lane.b32.xlu1 %v1648_v60, %s1512_s20 }
 0x100   : > { %v694_v62 = vadd.f32 %v1616_v22, %v655_v48  ;;  %v709_v63 = vadd.f32 %v1616_v22, %v670_v50  ;;  %v707_v0 = vadd.f32 %v1616_v22, %v668_v51  ;;  %v725_v3 = vmax.f32 %v693_v56, 0.0 }
 0x101   : > { %v723_v4 = vmax.f32 %v691_v57, 0.0  ;;  %v692_v5 = vadd.f32 %v1616_v22, %v653_v58  ;;  %v710_v6 = vadd.f32 %v1616_v22, %v671_v52  ;;  %v708_v10 = vadd.f32 %v1616_v22, %v669_v59  ;;  %v1447_v14 = vpop.f32.mrb[12].mxu0  ;;  %v1463_v15 = vpop.f32.mrb[12].mxu1 }
 0x102   : > { %v726_v7 = vmax.f32 %v694_v62, 0.0  ;;  %v741_v8 = vmax.f32 %v709_v63, 0.0  ;;  %v739_v9 = vmax.f32 %v707_v0, 0.0  ;;  %v1758_v60 = vpack.c.bf16 %v725_v3, %v725_v3  ;;  %940 = vrot.lane.b32.xlu0 %v1642_v55, %s1511_s19  ;;  %v558_v21 = vpop.f32.mrb[13].mxu0  ;;  %v622_v23 = vpop.f32.mrb[13].mxu1 }
 0x103   : > { %v1760_v11 = vpack.c.bf16 %v723_v4, %v723_v4  ;;  %v724_v12 = vmax.f32 %v692_v5, 0.0  ;;  %v742_v13 = vmax.f32 %v710_v6, 0.0  ;;  %1074 = vrot.lane.b32.xlu1 %v1650_v61, %s1512_s20  ;;  %v740_v19 = vmax.f32 %v708_v10, 0.0  ;;  %v1448_v28 = vpop.f32.mrb[14].mxu0  ;;  %v1464_v29 = vpop.f32.mrb[14].mxu1 }
 0x104   : > { %v1766_v16 = vpack.c.bf16 %v726_v7, %v726_v7  ;;  %v1768_v17 = vpack.c.bf16 %v741_v8, %v741_v8  ;;  %v1770_v18 = vpack.c.bf16 %v739_v9, %v739_v9  ;;  %886 = vst.msk [vmem:[%s1636_s18 + $0x28] sm:$0xf] %vm875_vm1, %v1758_v60  ;;  %v658_v25 = vmul.f32 %v1447_v14, %v1611_v20  ;;  %v561_v34 = vpop.f32.mrb[15].mxu0  ;;  %v625_v40 = vpop.f32.mrb[15].mxu1 }
 0x105   : > { %884 = vst.msk [vmem:[%s1636_s18 + $0x20] sm:$0xf] %vm875_vm1, %v1760_v11  ;;  %v1778_v24 = vpack.c.bf16 %v724_v12, %v724_v12  ;;  %v1780_v61 = vpack.c.bf16 %v742_v13, %v742_v13  ;;  %v656_v26 = vmul.f32 %v1611_v20, %v558_v21  ;;  %v1793_v30 = vpack.c.bf16 %v740_v19, %v740_v19 }
 0x106   : > { %887 = vst.msk [vmem:[%s1636_s18 + $0x2c] sm:$0xf] %vm875_vm1, %v1766_v16  ;;  %902 = vst.msk [vmem:[%s1636_s18 + $0x68] sm:$0xf] %vm875_vm1, %v1768_v17  ;;  %v659_v32 = vmul.f32 %v1448_v28, %v1611_v20  ;;  %v674_v35 = vmul.f32 %v1463_v15, %v1611_v20  ;;  %v672_v36 = vmul.f32 %v1611_v20, %v622_v23  ;;  %1036 = vrot.lane.b32.xlu0 %v1640_v54, %s1512_s20 }
 0x107   : > { %900 = vst.msk [vmem:[%s1636_s18 + $0x60] sm:$0xf] %vm875_vm1, %v1770_v18  ;;  %885 = vst.msk [vmem:[%s1636_s18 + $0x24] sm:$0xf] %vm875_vm1, %v1778_v24  ;;  %v697_v41 = vadd.f32 %v1616_v22, %v658_v25  ;;  %v695_v44 = vadd.f32 %v1616_v22, %v656_v26  ;;  %v657_v45 = vmul.f32 %v1611_v20, %v561_v34  ;;  %942 = vrot.lane.b32.xlu1 %v1663_v2, %s1511_s19 }
 0x108   : > { %903 = vst.msk [vmem:[%s1636_s18 + $0x6c] sm:$0xf] %vm875_vm1, %v1780_v61  ;;  %v675_v46 = vmul.f32 %v1464_v29, %v1611_v20  ;;  %901 = vst.msk [vmem:[%s1636_s18 + $0x64] sm:$0xf] %vm875_vm1, %v1793_v30  ;;  %v698_v47 = vadd.f32 %v1616_v22, %v659_v32  ;;  %v713_v48 = vadd.f32 %v1616_v22, %v674_v35 }
 0x109   : > { %v711_v49 = vadd.f32 %v1616_v22, %v672_v36  ;;  %v729_v50 = vmax.f32 %v697_v41, 0.0  ;;  %v727_v51 = vmax.f32 %v695_v44, 0.0  ;;  %v696_v52 = vadd.f32 %v1616_v22, %v657_v45 }
 0x10a   : > { %v714_v54 = vadd.f32 %v1616_v22, %v675_v46  ;;  %v730_v53 = vmax.f32 %v698_v47, 0.0  ;;  %v745_v56 = vmax.f32 %v713_v48, 0.0  ;;  %v673_v58 = vmul.f32 %v1611_v20, %v625_v40  ;;  %1068 = vrot.lane.b32.xlu0 %v1642_v55, %s1512_s20 }
 0x10b   : > { %v743_v57 = vmax.f32 %v711_v49, 0.0  ;;  %v1387_v59 = vpack.c.bf16 %v729_v50, %v729_v50  ;;  %v1821_v62 = vpack.c.bf16 %v727_v51, %v727_v51  ;;  %v728_v63 = vmax.f32 %v696_v52, 0.0  ;;  %1038 = vrot.lane.b32.xlu1 %v1661_v1, %s1512_s20 }
 0x10c   : > { %v746_v0 = vmax.f32 %v714_v54, 0.0  ;;  %v1388_v3 = vpack.c.bf16 %v730_v53, %v730_v53  ;;  %v1827_v4 = vpack.c.bf16 %v745_v56, %v745_v56  ;;  %v712_v7 = vadd.f32 %v1616_v22, %v673_v58 }
 0x10d   : > { %v1829_v20 = vpack.c.bf16 %v743_v57, %v743_v57  ;;  %890 = vst.msk [vmem:[%s1636_s18 + $0x38] sm:$0xf] %vm875_vm1, %v1387_v59  ;;  %888 = vst.msk [vmem:[%s1636_s18 + $0x30] sm:$0xf] %vm875_vm1, %v1821_v62  ;;  %v1386_v5 = vpack.c.bf16 %v728_v63, %v728_v63 }
 0x10e   : > { %v1836_v6 = vpack.c.bf16 %v746_v0, %v746_v0  ;;  %891 = vst.msk [vmem:[%s1636_s18 + $0x3c] sm:$0xf] %vm875_vm1, %v1388_v3  ;;  %906 = vst.msk [vmem:[%s1636_s18 + $0x78] sm:$0xf] %vm875_vm1, %v1827_v4  ;;  %v744_v55 = vmax.f32 %v712_v7, 0.0  ;;  %910 = vrot.lane.b32.xlu0 %v1661_v1, %s1511_s19 }
 0x10f   : > { %904 = vst.msk [vmem:[%s1636_s18 + $0x70] sm:$0xf] %vm875_vm1, %v1829_v20  ;;  %889 = vst.msk [vmem:[%s1636_s18 + $0x34] sm:$0xf] %vm875_vm1, %v1386_v5  ;;  %1070 = vrot.lane.b32.xlu1 %v1663_v2, %s1512_s20 }
 0x110   : > { %907 = vst.msk [vmem:[%s1636_s18 + $0x7c] sm:$0xf] %vm875_vm1, %v1836_v6  ;;  %v1402_v22 = vpack.c.bf16 %v744_v55, %v744_v55 }
 0x112   : > { %905 = vst.msk [vmem:[%s1636_s18 + $0x74] sm:$0xf] %vm875_vm1, %v1402_v22  ;;  %920 = vrot.lane.b32.xlu0 %v1695_v27, %s1511_s19 }
 0x113   : > { %922 = vrot.lane.b32.xlu1 %v1707_v37, %s1511_s19 }
 0x116   : > { %952 = vrot.lane.b32.xlu0 %v1699_v33, %s1511_s19 }
 0x117   : > { %954 = vrot.lane.b32.xlu1 %v1711_v39, %s1511_s19 }
 0x11a   : > { %1048 = vrot.lane.b32.xlu0 %v1695_v27, %s1512_s20 }
 0x11b   : > { %1050 = vrot.lane.b32.xlu1 %v1707_v37, %s1512_s20 }
 0x11e   : > { %1080 = vrot.lane.b32.xlu0 %v1699_v33, %s1512_s20 }
 0x11f   : > { %1082 = vrot.lane.b32.xlu1 %v1711_v39, %s1512_s20 }
 0x122   : > { %916 = vrot.lane.b32.xlu0 %v1697_v31, %s1511_s19 }
 0x123   : > { %918 = vrot.lane.b32.xlu1 %v1716_v42, %s1511_s19 }
 0x126   : > { %948 = vrot.lane.b32.xlu0 %v1709_v38, %s1511_s19 }
 0x127   : > { %950 = vrot.lane.b32.xlu1 %v1721_v43, %s1511_s19 }
 0x12a   : > { %1044 = vrot.lane.b32.xlu0 %v1697_v31, %s1512_s20 }
 0x12b   : > { %1046 = vrot.lane.b32.xlu1 %v1716_v42, %s1512_s20 }
 0x12e   : > { %1076 = vrot.lane.b32.xlu0 %v1709_v38, %s1512_s20 }
 0x12f   : > { %1078 = vrot.lane.b32.xlu1 %v1721_v43, %s1512_s20 }
 0x132   : > { %928 = vrot.lane.b32.xlu0 %v1758_v60, %s1511_s19 }
 0x133   : > { %930 = vrot.lane.b32.xlu1 %v1766_v16, %s1511_s19 }
 0x136   : > { %960 = vrot.lane.b32.xlu0 %v1768_v17, %s1511_s19 }
 0x137   : > { %962 = vrot.lane.b32.xlu1 %v1780_v61, %s1511_s19 }
 0x13a   : > { %1056 = vrot.lane.b32.xlu0 %v1758_v60, %s1512_s20 }
 0x13b   : > { %1058 = vrot.lane.b32.xlu1 %v1766_v16, %s1512_s20 }
 0x13e   : > { %1088 = vrot.lane.b32.xlu0 %v1768_v17, %s1512_s20 }
 0x13f   : > { %1090 = vrot.lane.b32.xlu1 %v1780_v61, %s1512_s20 }
 0x142   : > { %924 = vrot.lane.b32.xlu0 %v1760_v11, %s1511_s19 }
 0x143   : > { %926 = vrot.lane.b32.xlu1 %v1778_v24, %s1511_s19 }
 0x146   : > { %956 = vrot.lane.b32.xlu0 %v1770_v18, %s1511_s19 }
 0x147   : > { %958 = vrot.lane.b32.xlu1 %v1793_v30, %s1511_s19 }
 0x14a   : > { %1052 = vrot.lane.b32.xlu0 %v1760_v11, %s1512_s20 }
 0x14b   : > { %1054 = vrot.lane.b32.xlu1 %v1778_v24, %s1512_s20 }
 0x14e   : > { %1084 = vrot.lane.b32.xlu0 %v1770_v18, %s1512_s20 }
 0x14f   : > { %1086 = vrot.lane.b32.xlu1 %v1793_v30, %s1512_s20 }
 0x152   : > { %936 = vrot.lane.b32.xlu0 %v1387_v59, %s1511_s19 }
 0x153   : > { %938 = vrot.lane.b32.xlu1 %v1388_v3, %s1511_s19 }
 0x156   : > { %968 = vrot.lane.b32.xlu0 %v1827_v4, %s1511_s19 }
 0x157   : > { %970 = vrot.lane.b32.xlu1 %v1836_v6, %s1511_s19 }
 0x15a   : > { %1064 = vrot.lane.b32.xlu0 %v1387_v59, %s1512_s20 }
 0x15b   : > { %1066 = vrot.lane.b32.xlu1 %v1388_v3, %s1512_s20 }
 0x15e   : > { %932 = vrot.lane.b32.xlu0 %v1821_v62, %s1511_s19 }
 0x15f   : > { %934 = vrot.lane.b32.xlu1 %v1386_v5, %s1511_s19 }
 0x162   : > { %964 = vrot.lane.b32.xlu0 %v1829_v20, %s1511_s19 }
 0x163   : > { %966 = vrot.lane.b32.xlu1 %v1402_v22, %s1511_s19 }
 0x164   : > { %v945_v1 = vpop.permute.xlu0 %944  ;;  %v913_v2 = vpop.permute.xlu1 %912 }
 0x165   : > { %1022 = vst.msk [vmem:[%s1940_s24 + $0x48] sm:$0xf] %vm875_vm1, %v945_v1  ;;  %1006 = vst.msk [vmem:[%s1940_s24 + $0x8] sm:$0xf] %vm875_vm1, %v913_v2 }
 0x166   : > { %1060 = vrot.lane.b32.xlu0 %v1821_v62, %s1512_s20 }
 0x167   : > { %1062 = vrot.lane.b32.xlu1 %v1386_v5, %s1512_s20 }
 0x168   : > { %v1041_v27 = vpop.permute.xlu0 %1040 }
 0x169   : > { %v915_v31 = vpop.permute.xlu1 %914  ;;  %1134 = vst.msk [vmem:[%s1953_s27 + $0x8] sm:$0xf] %vm875_vm1, %v1041_v27 }
 0x16a   : > { %1007 = vst.msk [vmem:[%s1940_s24 + $0xc] sm:$0xf] %vm875_vm1, %v915_v31  ;;  %1092 = vrot.lane.b32.xlu0 %v1829_v20, %s1512_s20 }
 0x16b   : > { %1094 = vrot.lane.b32.xlu1 %v1402_v22, %s1512_s20 }
 0x16c   : > { %v1073_v33 = vpop.permute.xlu0 %1072 }
 0x16d   : > { %v947_v37 = vpop.permute.xlu1 %946  ;;  %1150 = vst.msk [vmem:[%s1953_s27 + $0x48] sm:$0xf] %vm875_vm1, %v1073_v33 }
 0x16e   : > { %1023 = vst.msk [vmem:[%s1940_s24 + $0x4c] sm:$0xf] %vm875_vm1, %v947_v37  ;;  %1096 = vrot.lane.b32.xlu0 %v1827_v4, %s1512_s20 }
 0x16f   : > { %1098 = vrot.lane.b32.xlu1 %v1836_v6, %s1512_s20 }
 0x170   : > { %v909_v38 = vpop.permute.xlu0 %908 }
 0x171   : > { %v1043_v39 = vpop.permute.xlu1 %1042  ;;  %1004 = vst.msk [vmem:[%s1940_s24] sm:$0xf] %vm875_vm1, %v909_v38 }
 0x172   : > { %1135 = vst.msk [vmem:[%s1953_s27 + $0xc] sm:$0xf] %vm875_vm1, %v1043_v39 }
 0x174   : > { %v941_v42 = vpop.permute.xlu0 %940 }
 0x175   : > { %v1075_v43 = vpop.permute.xlu1 %1074  ;;  %1020 = vst.msk [vmem:[%s1940_s24 + $0x40] sm:$0xf] %vm875_vm1, %v941_v42 }
 0x176   : > { %1151 = vst.msk [vmem:[%s1953_s27 + $0x4c] sm:$0xf] %vm875_vm1, %v1075_v43 }
 0x178   : > { %v1037_v8 = vpop.permute.xlu0 %1036 }
 0x179   : > { %v943_v9 = vpop.permute.xlu1 %942  ;;  %1132 = vst.msk [vmem:[%s1953_s27] sm:$0xf] %vm875_vm1, %v1037_v8 }
 0x17a   : > { %1021 = vst.msk [vmem:[%s1940_s24 + $0x44] sm:$0xf] %vm875_vm1, %v943_v9 }
 0x17c   : > { %v1069_v10 = vpop.permute.xlu0 %1068 }
 0x17d   : > { %v1039_v60 = vpop.permute.xlu1 %1038  ;;  %1148 = vst.msk [vmem:[%s1953_s27 + $0x40] sm:$0xf] %vm875_vm1, %v1069_v10 }
 0x17e   : > { %1133 = vst.msk [vmem:[%s1953_s27 + $0x4] sm:$0xf] %vm875_vm1, %v1039_v60 }
 0x180   : > { %v911_v12 = vpop.permute.xlu0 %910 }
 0x181   : > { %v1071_v11 = vpop.permute.xlu1 %1070  ;;  %1005 = vst.msk [vmem:[%s1940_s24 + $0x4] sm:$0xf] %vm875_vm1, %v911_v12 }
 0x182   : > { %1149 = vst.msk [vmem:[%s1953_s27 + $0x44] sm:$0xf] %vm875_vm1, %v1071_v11 }
 0x184   : > { %v921_v13 = vpop.permute.xlu0 %920 }
 0x185   : > { %v923_v14 = vpop.permute.xlu1 %922  ;;  %1010 = vst.msk [vmem:[%s1940_s24 + $0x18] sm:$0xf] %vm875_vm1, %v921_v13 }
 0x186   : > { %1011 = vst.msk [vmem:[%s1940_s24 + $0x1c] sm:$0xf] %vm875_vm1, %v923_v14 }
 0x188   : > { %v953_v15 = vpop.permute.xlu0 %952 }
 0x189   : > { %v955_v16 = vpop.permute.xlu1 %954  ;;  %1026 = vst.msk [vmem:[%s1940_s24 + $0x58] sm:$0xf] %vm875_vm1, %v953_v15 }
 0x18a   : > { %1027 = vst.msk [vmem:[%s1940_s24 + $0x5c] sm:$0xf] %vm875_vm1, %v955_v16 }
 0x18c   : > { %v1049_v17 = vpop.permute.xlu0 %1048 }
 0x18d   : > { %v1051_v18 = vpop.permute.xlu1 %1050  ;;  %1138 = vst.msk [vmem:[%s1953_s27 + $0x18] sm:$0xf] %vm875_vm1, %v1049_v17 }
 0x18e   : > { %1139 = vst.msk [vmem:[%s1953_s27 + $0x1c] sm:$0xf] %vm875_vm1, %v1051_v18 }
 0x190   : > { %v1081_v19 = vpop.permute.xlu0 %1080 }
 0x191   : > { %v1083_v21 = vpop.permute.xlu1 %1082  ;;  %1154 = vst.msk [vmem:[%s1953_s27 + $0x58] sm:$0xf] %vm875_vm1, %v1081_v19 }
 0x192   : > { %1155 = vst.msk [vmem:[%s1953_s27 + $0x5c] sm:$0xf] %vm875_vm1, %v1083_v21 }
 0x194   : > { %v917_v23 = vpop.permute.xlu0 %916 }
 0x195   : > { %v919_v24 = vpop.permute.xlu1 %918  ;;  %1008 = vst.msk [vmem:[%s1940_s24 + $0x10] sm:$0xf] %vm875_vm1, %v917_v23 }
 0x196   : > { %1009 = vst.msk [vmem:[%s1940_s24 + $0x14] sm:$0xf] %vm875_vm1, %v919_v24 }
 0x198   : > { %v949_v61 = vpop.permute.xlu0 %948 }
 0x199   : > { %v951_v25 = vpop.permute.xlu1 %950  ;;  %1024 = vst.msk [vmem:[%s1940_s24 + $0x50] sm:$0xf] %vm875_vm1, %v949_v61 }
 0x19a   : > { %1025 = vst.msk [vmem:[%s1940_s24 + $0x54] sm:$0xf] %vm875_vm1, %v951_v25 }
 0x19c   : > { %v1045_v26 = vpop.permute.xlu0 %1044 }
 0x19d   : > { %v1047_v28 = vpop.permute.xlu1 %1046  ;;  %1136 = vst.msk [vmem:[%s1953_s27 + $0x10] sm:$0xf] %vm875_vm1, %v1045_v26 }
 0x19e   : > { %1137 = vst.msk [vmem:[%s1953_s27 + $0x14] sm:$0xf] %vm875_vm1, %v1047_v28 }
 0x1a0   : > { %v1077_v29 = vpop.permute.xlu0 %1076 }
 0x1a1   : > { %v1079_v30 = vpop.permute.xlu1 %1078  ;;  %1152 = vst.msk [vmem:[%s1953_s27 + $0x50] sm:$0xf] %vm875_vm1, %v1077_v29 }
 0x1a2   : > { %1153 = vst.msk [vmem:[%s1953_s27 + $0x54] sm:$0xf] %vm875_vm1, %v1079_v30 }
 0x1a4   : > { %v929_v32 = vpop.permute.xlu0 %928 }
 0x1a5   : > { %v931_v34 = vpop.permute.xlu1 %930  ;;  %1014 = vst.msk [vmem:[%s1940_s24 + $0x28] sm:$0xf] %vm875_vm1, %v929_v32 }
 0x1a6   : > { %1015 = vst.msk [vmem:[%s1940_s24 + $0x2c] sm:$0xf] %vm875_vm1, %v931_v34 }
 0x1a8   : > { %v961_v35 = vpop.permute.xlu0 %960 }
 0x1a9   : > { %v963_v36 = vpop.permute.xlu1 %962  ;;  %1030 = vst.msk [vmem:[%s1940_s24 + $0x68] sm:$0xf] %vm875_vm1, %v961_v35 }
 0x1aa   : > { %1031 = vst.msk [vmem:[%s1940_s24 + $0x6c] sm:$0xf] %vm875_vm1, %v963_v36 }
 0x1ac   : > { %v1057_v40 = vpop.permute.xlu0 %1056 }
 0x1ad   : > { %v1059_v41 = vpop.permute.xlu1 %1058  ;;  %1142 = vst.msk [vmem:[%s1953_s27 + $0x28] sm:$0xf] %vm875_vm1, %v1057_v40 }
 0x1ae   : > { %1143 = vst.msk [vmem:[%s1953_s27 + $0x2c] sm:$0xf] %vm875_vm1, %v1059_v41 }
 0x1b0   : > { %v1089_v44 = vpop.permute.xlu0 %1088 }
 0x1b1   : > { %v1091_v45 = vpop.permute.xlu1 %1090  ;;  %1158 = vst.msk [vmem:[%s1953_s27 + $0x68] sm:$0xf] %vm875_vm1, %v1089_v44 }
 0x1b2   : > { %1159 = vst.msk [vmem:[%s1953_s27 + $0x6c] sm:$0xf] %vm875_vm1, %v1091_v45 }
 0x1b4   : > { %v925_v46 = vpop.permute.xlu0 %924 }
 0x1b5   : > { %v927_v47 = vpop.permute.xlu1 %926  ;;  %1012 = vst.msk [vmem:[%s1940_s24 + $0x20] sm:$0xf] %vm875_vm1, %v925_v46 }
 0x1b6   : > { %1013 = vst.msk [vmem:[%s1940_s24 + $0x24] sm:$0xf] %vm875_vm1, %v927_v47 }
 0x1b8   : > { %v957_v48 = vpop.permute.xlu0 %956 }
 0x1b9   : > { %v959_v49 = vpop.permute.xlu1 %958  ;;  %1028 = vst.msk [vmem:[%s1940_s24 + $0x60] sm:$0xf] %vm875_vm1, %v957_v48 }
 0x1ba   : > { %1029 = vst.msk [vmem:[%s1940_s24 + $0x64] sm:$0xf] %vm875_vm1, %v959_v49 }
 0x1bc   : > { %v1053_v50 = vpop.permute.xlu0 %1052 }
 0x1bd   : > { %v1055_v51 = vpop.permute.xlu1 %1054  ;;  %1140 = vst.msk [vmem:[%s1953_s27 + $0x20] sm:$0xf] %vm875_vm1, %v1053_v50 }
 0x1be   : > { %1141 = vst.msk [vmem:[%s1953_s27 + $0x24] sm:$0xf] %vm875_vm1, %v1055_v51 }
 0x1c0   : > { %v1085_v52 = vpop.permute.xlu0 %1084 }
 0x1c1   : > { %v1087_v54 = vpop.permute.xlu1 %1086  ;;  %1156 = vst.msk [vmem:[%s1953_s27 + $0x60] sm:$0xf] %vm875_vm1, %v1085_v52 }
 0x1c2   : > { %1157 = vst.msk [vmem:[%s1953_s27 + $0x64] sm:$0xf] %vm875_vm1, %v1087_v54 }
 0x1c4   : > { %v937_v53 = vpop.permute.xlu0 %936 }
 0x1c5   : > { %v939_v56 = vpop.permute.xlu1 %938  ;;  %1018 = vst.msk [vmem:[%s1940_s24 + $0x38] sm:$0xf] %vm875_vm1, %v937_v53 }
 0x1c6   : > { %1019 = vst.msk [vmem:[%s1940_s24 + $0x3c] sm:$0xf] %vm875_vm1, %v939_v56 }
 0x1c8   : > { %v969_v57 = vpop.permute.xlu0 %968 }
 0x1c9   : > { %v971_v58 = vpop.permute.xlu1 %970  ;;  %1034 = vst.msk [vmem:[%s1940_s24 + $0x78] sm:$0xf] %vm875_vm1, %v969_v57 }
 0x1ca   : > { %1035 = vst.msk [vmem:[%s1940_s24 + $0x7c] sm:$0xf] %vm875_vm1, %v971_v58 }
 0x1cc   : > { %v1065_v59 = vpop.permute.xlu0 %1064 }
 0x1cd   : > { %v1067_v62 = vpop.permute.xlu1 %1066  ;;  %1146 = vst.msk [vmem:[%s1953_s27 + $0x38] sm:$0xf] %vm875_vm1, %v1065_v59 }
 0x1ce   : > { %1147 = vst.msk [vmem:[%s1953_s27 + $0x3c] sm:$0xf] %vm875_vm1, %v1067_v62 }
 0x1d0   : > { %v933_v63 = vpop.permute.xlu0 %932 }
 0x1d1   : > { %v935_v0 = vpop.permute.xlu1 %934  ;;  %1016 = vst.msk [vmem:[%s1940_s24 + $0x30] sm:$0xf] %vm875_vm1, %v933_v63 }
 0x1d2   : > { %1017 = vst.msk [vmem:[%s1940_s24 + $0x34] sm:$0xf] %vm875_vm1, %v935_v0 }
 0x1d4   : > { %v965_v3 = vpop.permute.xlu0 %964 }
 0x1d5   : > { %v967_v4 = vpop.permute.xlu1 %966  ;;  %1032 = vst.msk [vmem:[%s1940_s24 + $0x70] sm:$0xf] %vm875_vm1, %v965_v3 }
 0x1d6   : > { %1033 = vst.msk [vmem:[%s1940_s24 + $0x74] sm:$0xf] %vm875_vm1, %v967_v4 }
 0x1d8   : > { %v1061_v20 = vpop.permute.xlu0 %1060 }
 0x1d9   : > { %v1063_v5 = vpop.permute.xlu1 %1062  ;;  %1144 = vst.msk [vmem:[%s1953_s27 + $0x30] sm:$0xf] %vm875_vm1, %v1061_v20 }
 0x1da   : > { %1145 = vst.msk [vmem:[%s1953_s27 + $0x34] sm:$0xf] %vm875_vm1, %v1063_v5 }
 0x1dc   : > { %v1093_v6 = vpop.permute.xlu0 %1092 }
 0x1dd   : > { %v1095_v7 = vpop.permute.xlu1 %1094  ;;  %1160 = vst.msk [vmem:[%s1953_s27 + $0x70] sm:$0xf] %vm875_vm1, %v1093_v6 }
 0x1de   : > { %1161 = vst.msk [vmem:[%s1953_s27 + $0x74] sm:$0xf] %vm875_vm1, %v1095_v7 }
 0x1e0   : > { %v1097_v55 = vpop.permute.xlu0 %1096 }
 0x1e1   : > { %v1099_v22 = vpop.permute.xlu1 %1098  ;;  %1162 = vst.msk [vmem:[%s1953_s27 + $0x78] sm:$0xf] %vm875_vm1, %v1097_v55 }
 0x1e2   : > { %1163 = vst.msk [vmem:[%s1953_s27 + $0x7c] sm:$0xf] %vm875_vm1, %v1099_v22 }
 0x1e3 PF: > { %s17_s21 = sadd.s32 1, %s1509_s21  }
 0x1e4   : > { %p14_p4 = scmp.ge.s32.totalorder %s17_s21, 4  }
 0x1e6   :  { %16 = sbr.rel (!%p14_p4) target bundleno = 1 (0x1), region = 90 }

</bundles_post_ra>
